<compile_context>
chip_gen: v7x
topology: tpu7x:2x2x1
jax: 0.10.0
libtpu: 0.0.40
codegen_flags: <defaults>
</compile_context>

<pallas_src>
import jax
import jax.numpy as jnp
from jax import lax
from jax.experimental import pallas as pl
from jax.experimental.pallas import tpu as pltpu


def _pooler_kernel(x_ref, w_ref, b_ref, o_ref):
    # x_ref: (B, H)   first-token activations (full K, resident across grid)
    # w_ref: (tn, H)  weight tile in PyTorch (out, in) layout
    # b_ref: (1, tn)  bias tile
    # o_ref: (B, tn)  output tile
    acc = lax.dot_general(
        x_ref[...], w_ref[...],
        dimension_numbers=(((1,), (1,)), ((), ())),   # contract x_in with w_in
        preferred_element_type=jnp.float32)           # MXU, f32 accumulation
    o_ref[...] = (acc + b_ref[...]).astype(o_ref.dtype)


def _pick_tn(H):
    # Lane-dense output tiles (multiple of 128) when the hidden size allows;
    # otherwise fall back to the full dimension (small / toy shapes).
    for tn in (512, 256, 128):
        if H % tn == 0:
            return tn
    return H


def bert_pooler(hidden_states, weight, bias):
    """hidden_states: (B, S, H); weight: (H, H) torch (out, in); bias: (H,)."""
    B, S, H = hidden_states.shape
    assert weight.shape == (H, H) and bias.shape == (H,)

    # Slice the first token in the wrapper: only B*H elements enter the kernel.
    first_token = hidden_states[:, 0, :]              # (B, H)
    b2d = bias.reshape(1, H)                          # 2D for TPU layout

    tn = _pick_tn(H)
    grid = (H // tn,)

    itemsize = jnp.dtype(hidden_states.dtype).itemsize
    cost = pl.CostEstimate(
        flops=2 * B * H * H,
        transcendentals=0,
        bytes_accessed=(H * H + 2 * B * H + H) * itemsize,
    )

    out = pl.pallas_call(
        _pooler_kernel,
        out_shape=jax.ShapeDtypeStruct((B, H), hidden_states.dtype),
        grid=grid,
        in_specs=[
            pl.BlockSpec((B, H), lambda j: (0, 0)),    # activations, resident
            pl.BlockSpec((tn, H), lambda j: (j, 0)),   # weight N-tile (out, in)
            pl.BlockSpec((1, tn), lambda j: (0, j)),   # bias N-tile
        ],
        out_specs=pl.BlockSpec((B, tn), lambda j: (0, j)),
        compiler_params=pltpu.CompilerParams(
            dimension_semantics=("parallel",)),        # shard N across v7x TCs
        cost_estimate=cost,
    )(first_token, weight, b2d)
    return out


if __name__ == "__main__":
    # Small smoke-test shapes consistent with BertPooler: batch=2, seq=8, hidden=32.
    # (Production BERT shapes, e.g. B>=16, H=768/1024, exercise the tiled/parallel path.)
    B, S, H = 2, 8, 32
    key = jax.random.PRNGKey(0)
    k_x, k_w, k_b = jax.random.split(key, 3)

    hidden_states = jax.random.normal(k_x, (B, S, H), dtype=jnp.float32)
    weight = jax.random.normal(k_w, (H, H), dtype=jnp.float32) * 0.02  # (out, in)
    bias = jax.random.normal(k_b, (H,), dtype=jnp.float32) * 0.02

    pooled = bert_pooler(hidden_states, weight, bias)
    pooled = jax.block_until_ready(pooled)

    # Reference (pure JAX) mirroring PyTorch nn.Linear semantics (no tanh in this module).
    ref = hidden_states[:, 0] @ weight.T + bias
    assert pooled.shape == (B, H)
    assert jnp.allclose(pooled, ref, atol=1e-5, rtol=1e-5)

    print("KERNEL_OK")
</pallas_src>

<mosaic_0001>
module attributes {stable_mosaic.version = 11 : i64} {
  func.func @_pooler_kernel(%arg0: i32, %arg1: memref<2x32xf32, #tpu.memory_space<vmem>>, %arg2: memref<32x32xf32, #tpu.memory_space<vmem>>, %arg3: memref<1x32xf32, #tpu.memory_space<vmem>>, %arg4: memref<2x32xf32, #tpu.memory_space<vmem>>) attributes {dimension_semantics = [#tpu.dimension_semantics<parallel>], iteration_bounds = array<i64: 1>, scalar_prefetch = 0 : i64, scratch_operands = 0 : i64, tpu.core_type = #tpu.core_type<tc>, window_params = [{pipeline_mode = #tpu.pipeline_mode<synchronous>, transform_indices = @transform_0, window_bounds = array<i64: 2, 32>}, {transform_indices = @transform_1, window_bounds = array<i64: 32, 32>}, {transform_indices = @transform_2, window_bounds = array<i64: 1, 32>}, {transform_indices = @transform_3, window_bounds = array<i64: 2, 32>}]} {
    %c0 = arith.constant 0 : index
    %c0_0 = arith.constant 0 : index
    %0 = vector.load %arg1[%c0, %c0_0] : memref<2x32xf32, #tpu.memory_space<vmem>>, vector<2x32xf32>
    %c0_1 = arith.constant 0 : index
    %c0_2 = arith.constant 0 : index
    %1 = vector.load %arg2[%c0_1, %c0_2] : memref<32x32xf32, #tpu.memory_space<vmem>>, vector<32x32xf32>
    %cst = arith.constant dense<0.000000e+00> : vector<2x32xf32>
    %2 = tpu.matmul %0, %1, %cst {dimension_numbers = #tpu.dot_dimension_numbers<[1], [1], [0], [0], [0, 0, 1, 0], [], []>} : vector<2x32xf32>, vector<32x32xf32>, vector<2x32xf32> -> vector<2x32xf32>
    %c0_3 = arith.constant 0 : index
    %c0_4 = arith.constant 0 : index
    %3 = vector.load %arg3[%c0_3, %c0_4] : memref<1x32xf32, #tpu.memory_space<vmem>>, vector<1x32xf32>
    %4 = vector.broadcast %3 : vector<1x32xf32> to vector<2x32xf32>
    %5 = arith.addf %2, %4 : vector<2x32xf32>
    %c0_5 = arith.constant 0 : index
    %c0_6 = arith.constant 0 : index
    %6 = vector.load %arg4[%c0_5, %c0_6] : memref<2x32xf32, #tpu.memory_space<vmem>>, vector<2x32xf32>
    tpu.vector_store %arg4[%c0_5, %c0_6], %5 {strides = array<i32>} : memref<2x32xf32, #tpu.memory_space<vmem>>, vector<2x32xf32>,
    return
  }
  func.func @transform_0(%arg0: i32) -> (i32, i32) {
    %c0_i32 = arith.constant 0 : i32
    %c0_i32_0 = arith.constant 0 : i32
    %c0_i32_1 = arith.constant 0 : i32
    return %c0_i32, %c0_i32_0 : i32, i32
  }
  func.func @transform_1(%arg0: i32) -> (i32, i32) {
    %c0_i32 = arith.constant 0 : i32
    %c0_i32_0 = arith.constant 0 : i32
    return %arg0, %c0_i32 : i32, i32
  }
  func.func @transform_2(%arg0: i32) -> (i32, i32) {
    %c0_i32 = arith.constant 0 : i32
    %c0_i32_0 = arith.constant 0 : i32
    return %c0_i32, %arg0 : i32, i32
  }
  func.func @transform_3(%arg0: i32) -> (i32, i32) {
    %c0_i32 = arith.constant 0 : i32
    %c0_i32_0 = arith.constant 0 : i32
    return %c0_i32, %arg0 : i32, i32
  }
}

</mosaic_0001>

<bundles_post_ra>
// kernel: tpu_custom_call.1
= control target key start
LH: loop header
LB: loop body
LE: loop exit
PB: predicated region body
PF: predicated region fallthrough
CT: control target
= control target key end

     0   :  { %8 = vsyncpa [#allocation3], 0  ;;  %s341_s0 = inlined_call_operand.hbm [shape: f32[2,32], index: 0, kind: input, shape index: {}]   ;;  %s342_s1 = inlined_call_operand.hbm [shape: f32[32,32], index: 1, kind: input, shape index: {}]   ;;  %s343_s2 = inlined_call_operand.vmem [shape: f32[1,32], index: 2, kind: input, shape index: {}]   ;;  %s344_s3 = inlined_call_operand.hbm [shape: f32[2,32], index: 3, kind: output, shape index: {}]  }
   0x1   :  { %9 = vsyncpa [#allocation6], 0 }
   0x2   :  { %10 = vsyncpa [#allocation4], 0  ;;  %s267_s12 = smov [#allocation2]   ;;  %s268_s14 = smov [#allocation5]  }
   0x3   :  { %s17_s13 = sshll.u32 %s267_s12, 4  ;;  %s26_s15 = sshll.u32 %s268_s14, 4  ;;  %s18_s13 = int_to_ptr.vmem [resolvable:$true] %s17_s13  ;;  %s295_s15 = int_to_ptr.vmem [resolvable:$true] %s26_s15 }
   0x4   :  { %s195_s18 = scalar_lea.hbm %s341_s0, 32 }
   0x5   :  { %p196_p0 = scmp.ne.s32.totalorder %s341_s0, %s195_s18  ;;  %p199_p1 = scmp.lt.u32.totalorder %s195_s18, %s341_s0 }
   0x7   :  { %p201_p2 = pnand %p199_p1, %p196_p0 }
   0x9   :  { %204 = shalt.err (!%p201_p2)
}
   0xa   :  { %s205_s23 = scalar_lea.vmem %s18_s13, 32  ;;  %p210_p4 = scmp.lt.s32.totalorder %s18_s13, %s18_s13 }
   0xb   :  { %p206_p3 = scmp.ne.s32.totalorder %s18_s13, %s205_s23  ;;  %p211_p5 = scmp.lt.s32.totalorder %s205_s23, %s205_s23 }
   0xd   :  { %p212_p6 = por %p211_p5, %p210_p4 }
   0xf   :  { %p213_p7 = pnand %p212_p6, %p206_p3 }
  0x11   :  { %216 = shalt.err (!%p213_p7)
}
  0x12   :  { %20 = dma.hbm_to_vmem [thread:$0]  %s341_s0, 32, %s18_s13, [#allocation3]  }
  0x13   :  { %s217_s28 = scalar_lea.hbm %s342_s1, 512 }
  0x14   :  { %p218_p8 = scmp.ne.s32.totalorder %s342_s1, %s217_s28  ;;  %p221_p9 = scmp.lt.u32.totalorder %s217_s28, %s342_s1 }
  0x16   :  { %p223_p10 = pnand %p221_p9, %p218_p8 }
  0x18   :  { %226 = shalt.err (!%p223_p10)
}
  0x19   :  { %s227_s6 = scalar_lea.vmem %s295_s15, 512  ;;  %p232_p12 = scmp.lt.s32.totalorder %s295_s15, %s295_s15 }
  0x1a   :  { %p228_p11 = scmp.ne.s32.totalorder %s295_s15, %s227_s6  ;;  %p233_p13 = scmp.lt.s32.totalorder %s227_s6, %s227_s6 }
  0x1c   :  { %p234_p0 = por %p233_p13, %p232_p12 }
  0x1e   :  { %p235_p1 = pnand %p234_p0, %p228_p11 }
  0x20   :  { %238 = shalt.err (!%p235_p1)
}
  0x21   :  { %s269_s0 = smov 128   ;;  %s270_s7 = smov 8  }
  0x22   :  { %32 = dma.hbm_to_vmem [thread:$0]  %s342_s1, 512, %s295_s15, [#allocation6], %s269_s0, %s269_s0, %s270_s7  }
  0x23   :  { %261 = dma.done.wait [#allocation3], 32  }
  0x24   :  { %262 = vsyncadd [#allocation3], 4294967264 }
  0x25   :  { %263 = dma.done.wait [#allocation6], 512  }
  0x26   :  { %264 = vsyncadd [#allocation6], 4294966784  ;;  %v271_v0 = vmov 0.0|0.0   ;;  %vm272_vm0 = vmmov 0   ;;  %v273_v1 = vmov 0.0   ;;  %vm53_vm1 = vcmask 261120  }
  0x27   :  { %179 = vmatprep.subr.bf16.mxu0 %v271_v0  ;;  %176 = vmatprep.mubr.msk.f32.mxu0 %vm272_vm0, %v273_v1  ;;  %v42_v2 = vld [vmem:[#allocation5] sm:$0xff]  ;;  %v43_v3 = vld [vmem:[#allocation5 + $0x8] sm:$0xff]  ;;  %vm181_vm2 = vmpackc.low %vm53_vm1, %vm53_vm1  ;;  %s274_s11 = smov [#allocation7]   ;;  %vm139_vm3 = vcmask 254976  }
  0x28   :  { %v180_v4 = vpack.c.bf16 %v43_v3, %v42_v2  ;;  %v44_v5 = vld [vmem:[#allocation5 + $0x10] sm:$0xff]  ;;  %v45_v6 = vld [vmem:[#allocation5 + $0x18] sm:$0xff]  ;;  %s147_s12 = sshll.u32 %s274_s11, 4  ;;  %s148_s12 = int_to_ptr.vmem [resolvable:$true] %s147_s12 }
  0x29   :  { %v184_v7 = vpack.c.bf16 %v45_v6, %v44_v5  ;;  %v41_v8 = vld [vmem:[#allocation2] sm:$0x3]  ;;  %s239_s13 = scalar_lea.vmem %s148_s12, 32  ;;  %p244_p3 = scmp.lt.s32.totalorder %s148_s12, %s148_s12 }
  0x2a   :  { %182 = vmatpush3.bf16.xpose.msk.msra.mxu0 %vm181_vm2, %v180_v4  ;;  %v157_v9 = vld [vmem:[%s343_s2] ss:$0 sm:$0xff]  ;;  %p240_p2 = scmp.ne.s32.totalorder %s148_s12, %s239_s13  ;;  %p245_p4 = scmp.lt.s32.totalorder %s239_s13, %s239_s13 }
  0x2b   :  { %183 = vmatprep.subr.bf16.mxu0 %v271_v0 }
  0x2c   :  { %p246_p5 = por %p245_p4, %p244_p3 }
  0x2e   :  { %p247_p6 = pnand %p246_p5, %p240_p2 }
  0x32   :  { %186 = vmatpush3.bf16.xpose.msk.msra.mxu0 %vm181_vm2, %v184_v7 }
  0x39   :  { %177 = vmatmul.mubr.msk.f32.vlgmr.msra.gmra.mrb[0].mxu0 %vm53_vm1, %v41_v8 }
 0x10c   :  { %v135_v10 = vpop.f32.mrb[0].mxu0 }
 0x10d   :  { %v136_v11 = vadd.f32 %v157_v9, %v135_v10  ;;  %v178_v12 = vpop.f32.mrb[1].mxu0 }
 0x10f   :  { %140 = vst.msk [vmem:[#allocation7] sm:$0x3] %vm139_vm3, %v136_v11 }
 0x110   :  { %250 = shalt.err (!%p247_p6)
}
 0x111   :  { %s251_s16 = scalar_lea.hbm %s344_s3, 32 }
 0x112   :  { %p252_p7 = scmp.ne.s32.totalorder %s344_s3, %s251_s16  ;;  %p255_p8 = scmp.lt.u32.totalorder %s251_s16, %s344_s3 }
 0x114   :  { %p257_p9 = pnand %p255_p8, %p252_p7 }
 0x116   :  { %260 = shalt.err (!%p257_p9)
}
 0x117   :  { %150 = dma.vmem_to_hbm [thread:$0]  %s148_s12, 32, %s344_s3, [#allocation4]  }
 0x118   :  { %265 = dma.done.wait [#allocation4], 32  }
 0x119   :  { %266 = vsyncadd [#allocation4], 4294967264 }
 0x11a   :  { %154 = vsyncpa [#allocation3], 1 }
 0x11b   :  { %155 = vsyncpa [#allocation6], 1 }
 0x11c   :  { %156 = vsyncpa [#allocation4], 1 }

</bundles_post_ra>
